<compile_context>
chip_gen: v5e
topology: v5e:2x2
jax: 0.10.0
libtpu: 0.0.40
codegen_flags: <defaults>
</compile_context>

<pallas_src>
import functools

import jax
import jax.numpy as jnp
from jax import lax
from jax.experimental import pallas as pl
from jax.experimental.pallas import tpu as pltpu


def _fused_conv_bn_kernel(x_ref, w_ref, gb_ref, out_ref, *,
                          N, H, W, C_pad, C_out, eps):
    HW = H * W
    xall = x_ref[...]                                   # (N*C_pad, HW)

    # Lane-position iotas used to build the 3x3 zero-padding validity masks
    # in-kernel (no mask-input DMA).  Row validity only needs the flat lane
    # index; column validity needs the column index within a spatial row.
    pos = lax.broadcasted_iota(jnp.int32, (N * C_pad, HW), 1)
    if (W & (W - 1)) == 0:                              # power-of-two W (CIFAR)
        col = jnp.bitwise_and(pos, W - 1)
    else:
        col = lax.rem(pos, W)

    # --- im2col for the whole batch: XLU lane rolls + VPU selects -------------
    tap_blocks = []                                     # 9 x (N*C_pad, HW)
    for dy in range(3):
        for dx in range(3):
            oy, ox = dy - 1, dx - 1
            d = oy * W + ox                             # flat spatial offset
            if d == 0:
                shifted = xall
            else:
                # want T[:, p] = x[:, p + d]; wrapped positions are masked below
                shifted = pltpu.roll(xall, shift=(-d) % HW, axis=1)
            conds = []
            if oy < 0:
                conds.append(pos >= -oy * W)            # row r + oy >= 0
            elif oy > 0:
                conds.append(pos < HW - oy * W)         # row r + oy < H
            if ox < 0:
                conds.append(col >= -ox)                # col c + ox >= 0
            elif ox > 0:
                conds.append(col < W - ox)              # col c + ox < W
            if conds:
                valid = conds[0]
                for cc in conds[1:]:
                    valid = valid & cc
                shifted = jnp.where(valid, shifted, 0.0)
            tap_blocks.append(shifted)

    # Assemble (9*C_pad, N*HW): column block n*HW:(n+1)*HW stacks the nine taps
    # of image n along rows.  All slices are sublane-aligned (C_pad % 8 == 0)
    # and all column blocks are 128-lane aligned (HW multiple of 128).
    per_image = []
    for n in range(N):
        rows = [tb[n * C_pad:(n + 1) * C_pad, :] for tb in tap_blocks]
        per_image.append(jnp.concatenate(rows, axis=0))   # (9*C_pad, HW)
    patches = jnp.concatenate(per_image, axis=1)          # (9*C_pad, N*HW)

    # --- ONE MXU matmul for the whole batch ------------------------------------
    # TODO(synk): at realistic sizes cast x/w to bf16 (keep f32 accumulation)
    # to hit the bf16 MXU path on v6e/v7x; at C_in >= 128 drop the materialized
    # im2col and accumulate 9 K=C_in matmuls instead.
    y = jnp.dot(w_ref[...], patches,
                preferred_element_type=jnp.float32)       # (C_out, N*HW)

    # --- training-mode BatchNorm2d (biased batch stats, two-pass) --------------
    # Stats are per output channel over (N, H, W) == per-row mean/var of y.
    mean = jnp.mean(y, axis=1, keepdims=True)             # (C_out, 1)
    diff = y - mean
    var = jnp.mean(diff * diff, axis=1, keepdims=True)    # (C_out, 1)
    gb = gb_ref[...]                                      # (C_out, 2)
    gamma = gb[:, 0:1]
    beta = gb[:, 1:2]
    scale = gamma * lax.rsqrt(var + eps)
    shift = beta - mean * scale
    yn = y * scale + shift                                # (C_out, N*HW)

    # Single write of the output; per-image column slices are 256-lane aligned.
    for n in range(N):
        out_ref[n] = yn[:, n * HW:(n + 1) * HW]


def _conv_bn(x_nchw, weights, gamma, beta, eps=1e-5):
    x = x_nchw.astype(jnp.float32)
    N, C_in, H, W = x.shape
    C_out = weights.shape[0]
    HW = H * W
    C_pad = ((C_in + 7) // 8) * 8      # sublane-align every tap chunk

    if C_pad != C_in:
        x = jnp.pad(x, ((0, 0), (0, C_pad - C_in), (0, 0), (0, 0)))
    # (N, C_pad, H, W) -> (N*C_pad, H*W): metadata-only; spatial on the lane axis
    x_flat = x.reshape(N * C_pad, HW)

    # (C_out, C_in, 3, 3) -> (C_out, 9*C_pad), column = (dy*3+dx)*C_pad + c
    w = jnp.transpose(weights.astype(jnp.float32), (0, 2, 3, 1))
    if C_pad != C_in:
        w = jnp.pad(w, ((0, 0), (0, 0), (0, 0), (0, C_pad - C_in)))
    wmat = w.reshape(C_out, 9 * C_pad)

    # gamma/beta merged into one tiny input (one DMA instead of two)
    gb = jnp.stack([gamma.astype(jnp.float32), beta.astype(jnp.float32)], axis=1)

    kernel = functools.partial(_fused_conv_bn_kernel, N=N, H=H, W=W,
                               C_pad=C_pad, C_out=C_out, eps=eps)

    out_flat = pl.pallas_call(
        kernel,
        out_shape=jax.ShapeDtypeStruct((N, C_out, HW), jnp.float32),
        grid_spec=pltpu.PrefetchScalarGridSpec(
            num_scalar_prefetch=0,
            # Whole problem fits VMEM (<0.5 MB): one grid step, no pipeline
            # overhead.
            # TODO(synk): for large N/H/W tile the batch across a "parallel"
            # grid axis (v7x: 2 TCs) with per-tile partial BN sums combined in
            # a second phase, and re-budget tiles against v7x's 64 MiB VMEM
            # (x_tile + 9*x_tile + out_tile, double-buffered) via
            # vmem_limit_bytes.
            grid=(1,),
            in_specs=[
                pl.BlockSpec((N * C_pad, HW), lambda i: (0, 0)),
                pl.BlockSpec((C_out, 9 * C_pad), lambda i: (0, 0)),
                pl.BlockSpec((C_out, 2), lambda i: (0, 0)),
            ],
            out_specs=pl.BlockSpec((N, C_out, HW), lambda i: (0, 0, 0)),
        ),
        compiler_params=pltpu.CompilerParams(
            dimension_semantics=("arbitrary",)),
    )(x_flat, wmat, gb)

    # metadata-only reshape back to the PyTorch-facing NCHW contract
    return out_flat.reshape(N, C_out, H, W)


# ----------------------------------------------------------------------------
# Module-equivalent parameter init + forward
# ----------------------------------------------------------------------------
def init_convolution13(key, in_features, out_features):
    # kaiming_normal_(mode='fan_out', nonlinearity='relu'):
    #   fan_out = out_features * 3 * 3, std = sqrt(2 / fan_out)
    std = (2.0 / (out_features * 3 * 3)) ** 0.5
    weights = std * jax.random.normal(
        key, (out_features, in_features, 3, 3), jnp.float32)
    gamma = jnp.ones((out_features,), jnp.float32)   # BN weight default
    beta = jnp.zeros((out_features,), jnp.float32)   # BN bias default
    return {"weights": weights, "gamma": gamma, "beta": beta}


def convolution13_forward(params, x_nchw, epoch, gate, i):
    weights = params["weights"]
    gamma, beta = params["gamma"], params["beta"]
    C_out = weights.shape[0]

    if epoch < 4:
        return _conv_bn(x_nchw, weights, gamma, beta)
    # epoch >= 4: parity only flips requires_grad in PyTorch -> no forward effect
    if i == 0:
        # ~1 KB of data: a pallas_call here would be pure launch overhead.
        return jnp.mean(weights.reshape(C_out, -1), axis=1)
    gated_w = weights * gate.reshape(C_out, 1, 1, 1)
    return _conv_bn(x_nchw, gated_w, gamma, beta)


# ----------------------------------------------------------------------------
# Pure-JAX reference (correctness check)
# ----------------------------------------------------------------------------
def _reference_conv_bn(x, w, gamma, beta, eps=1e-5):
    y = lax.conv_general_dilated(
        x, w, window_strides=(1, 1), padding="SAME",
        dimension_numbers=("NCHW", "OIHW", "NCHW"),
        precision=lax.Precision.HIGHEST)
    mean = jnp.mean(y, axis=(0, 2, 3), keepdims=True)
    var = jnp.mean((y - mean) ** 2, axis=(0, 2, 3), keepdims=True)
    yn = (y - mean) * lax.rsqrt(var + eps)
    return yn * gamma.reshape(1, -1, 1, 1) + beta.reshape(1, -1, 1, 1)


if __name__ == "__main__":
    key = jax.random.PRNGKey(0)
    k_w, k_x, k_g = jax.random.split(key, 3)

    in_features, out_features = 4, 8
    N, H, W = 2, 16, 16

    params = init_convolution13(k_w, in_features, out_features)
    x = jax.random.normal(k_x, (N, in_features, H, W), jnp.float32)
    gate = jax.random.uniform(k_g, (out_features,), jnp.float32)

    # Branch 1: epoch < 4
    out1 = convolution13_forward(params, x, epoch=0, gate=gate, i=1)
    # Branch 2: epoch >= 4, i == 0 -> per-channel weight mean
    data = convolution13_forward(params, x, epoch=4, gate=gate, i=0)
    # Branch 3: epoch >= 4, i != 0 -> gated-weight conv
    out3 = convolution13_forward(params, x, epoch=5, gate=gate, i=1)
    jax.block_until_ready((out1, data, out3))

    assert out1.shape == (N, out_features, H, W)
    assert data.shape == (out_features,)
    assert out3.shape == (N, out_features, H, W)

    # correctness vs. pure-JAX reference (conv + training-mode BN)
    ref1 = _reference_conv_bn(x, params["weights"], params["gamma"], params["beta"])
    gw = params["weights"] * gate.reshape(out_features, 1, 1, 1)
    ref3 = _reference_conv_bn(x, gw, params["gamma"], params["beta"])
    ref_data = jnp.mean(params["weights"].reshape(out_features, -1), axis=1)
    assert jnp.allclose(out1, ref1, atol=3e-2, rtol=3e-2), \
        float(jnp.max(jnp.abs(out1 - ref1)))
    assert jnp.allclose(out3, ref3, atol=3e-2, rtol=3e-2), \
        float(jnp.max(jnp.abs(out3 - ref3)))
    assert jnp.allclose(data, ref_data, atol=1e-5)

    print("KERNEL_OK")
</pallas_src>

<mosaic_0001>
module attributes {stable_mosaic.version = 11 : i64} {
  func.func @_fused_conv_bn_kernel(%arg0: i32, %arg1: memref<16x256xf32, #tpu.memory_space<vmem>>, %arg2: memref<8x72xf32, #tpu.memory_space<vmem>>, %arg3: memref<8x2xf32, #tpu.memory_space<vmem>>, %arg4: memref<2x8x256xf32, #tpu.memory_space<vmem>>) attributes {dimension_semantics = [#tpu.dimension_semantics<arbitrary>], iteration_bounds = array<i64: 1>, scalar_prefetch = 0 : i64, scratch_operands = 0 : i64, tpu.core_type = #tpu.core_type<tc>, window_params = [{pipeline_mode = #tpu.pipeline_mode<synchronous>, transform_indices = @transform_0, window_bounds = array<i64: 16, 256>}, {pipeline_mode = #tpu.pipeline_mode<synchronous>, transform_indices = @transform_1, window_bounds = array<i64: 8, 72>}, {pipeline_mode = #tpu.pipeline_mode<synchronous>, transform_indices = @transform_2, window_bounds = array<i64: 8, 2>}, {pipeline_mode = #tpu.pipeline_mode<synchronous>, transform_indices = @transform_3, window_bounds = array<i64: 2, 8, 256>}]} {
    %c0 = arith.constant 0 : index
    %c0_0 = arith.constant 0 : index
    %0 = vector.load %arg1[%c0, %c0_0] : memref<16x256xf32, #tpu.memory_space<vmem>>, vector<16x256xf32>
    %1 = tpu.iota {dimensions = array<i32: 1>} : vector<16x256xi32>
    %c15_i32 = arith.constant 15 : i32
    %2 = vector.broadcast %c15_i32 : i32 to vector<16x256xi32>
    %3 = arith.andi %1, %2 : vector<16x256xi32>
    %c17_i32 = arith.constant 17 : i32
    %4 = tpu.dynamic_rotate %0 by %c17_i32 dim 1 : vector<16x256xf32>, i32 -> vector<16x256xf32>
    %c16_i32 = arith.constant 16 : i32
    %5 = vector.broadcast %c16_i32 : i32 to vector<16x256xi32>
    %6 = arith.cmpi sge, %1, %5 : vector<16x256xi32>
    %c1_i32 = arith.constant 1 : i32
    %7 = vector.broadcast %c1_i32 : i32 to vector<16x256xi32>
    %8 = arith.cmpi sge, %3, %7 : vector<16x256xi32>
    %9 = arith.andi %6, %8 : vector<16x256xi1>
    %cst = arith.constant 0.000000e+00 : f32
    %10 = vector.broadcast %cst : f32 to vector<16x256xf32>
    %11 = arith.select %9, %4, %10 : vector<16x256xi1>, vector<16x256xf32>
    %c16_i32_1 = arith.constant 16 : i32
    %12 = tpu.dynamic_rotate %0 by %c16_i32_1 dim 1 : vector<16x256xf32>, i32 -> vector<16x256xf32>
    %c16_i32_2 = arith.constant 16 : i32
    %13 = vector.broadcast %c16_i32_2 : i32 to vector<16x256xi32>
    %14 = arith.cmpi sge, %1, %13 : vector<16x256xi32>
    %cst_3 = arith.constant 0.000000e+00 : f32
    %15 = vector.broadcast %cst_3 : f32 to vector<16x256xf32>
    %16 = arith.select %14, %12, %15 : vector<16x256xi1>, vector<16x256xf32>
    %c15_i32_4 = arith.constant 15 : i32
    %17 = tpu.dynamic_rotate %0 by %c15_i32_4 dim 1 : vector<16x256xf32>, i32 -> vector<16x256xf32>
    %c16_i32_5 = arith.constant 16 : i32
    %18 = vector.broadcast %c16_i32_5 : i32 to vector<16x256xi32>
    %19 = arith.cmpi sge, %1, %18 : vector<16x256xi32>
    %c15_i32_6 = arith.constant 15 : i32
    %20 = vector.broadcast %c15_i32_6 : i32 to vector<16x256xi32>
    %21 = arith.cmpi slt, %3, %20 : vector<16x256xi32>
    %22 = arith.andi %19, %21 : vector<16x256xi1>
    %cst_7 = arith.constant 0.000000e+00 : f32
    %23 = vector.broadcast %cst_7 : f32 to vector<16x256xf32>
    %24 = arith.select %22, %17, %23 : vector<16x256xi1>, vector<16x256xf32>
    %c1_i32_8 = arith.constant 1 : i32
    %25 = tpu.dynamic_rotate %0 by %c1_i32_8 dim 1 : vector<16x256xf32>, i32 -> vector<16x256xf32>
    %c1_i32_9 = arith.constant 1 : i32
    %26 = vector.broadcast %c1_i32_9 : i32 to vector<16x256xi32>
    %27 = arith.cmpi sge, %3, %26 : vector<16x256xi32>
    %cst_10 = arith.constant 0.000000e+00 : f32
    %28 = vector.broadcast %cst_10 : f32 to vector<16x256xf32>
    %29 = arith.select %27, %25, %28 : vector<16x256xi1>, vector<16x256xf32>
    %c255_i32 = arith.constant 255 : i32
    %30 = tpu.dynamic_rotate %0 by %c255_i32 dim 1 : vector<16x256xf32>, i32 -> vector<16x256xf32>
    %c15_i32_11 = arith.constant 15 : i32
    %31 = vector.broadcast %c15_i32_11 : i32 to vector<16x256xi32>
    %32 = arith.cmpi slt, %3, %31 : vector<16x256xi32>
    %cst_12 = arith.constant 0.000000e+00 : f32
    %33 = vector.broadcast %cst_12 : f32 to vector<16x256xf32>
    %34 = arith.select %32, %30, %33 : vector<16x256xi1>, vector<16x256xf32>
    %c241_i32 = arith.constant 241 : i32
    %35 = tpu.dynamic_rotate %0 by %c241_i32 dim 1 : vector<16x256xf32>, i32 -> vector<16x256xf32>
    %c240_i32 = arith.constant 240 : i32
    %36 = vector.broadcast %c240_i32 : i32 to vector<16x256xi32>
    %37 = arith.cmpi slt, %1, %36 : vector<16x256xi32>
    %c1_i32_13 = arith.constant 1 : i32
    %38 = vector.broadcast %c1_i32_13 : i32 to vector<16x256xi32>
    %39 = arith.cmpi sge, %3, %38 : vector<16x256xi32>
    %40 = arith.andi %37, %39 : vector<16x256xi1>
    %cst_14 = arith.constant 0.000000e+00 : f32
    %41 = vector.broadcast %cst_14 : f32 to vector<16x256xf32>
    %42 = arith.select %40, %35, %41 : vector<16x256xi1>, vector<16x256xf32>
    %c240_i32_15 = arith.constant 240 : i32
    %43 = tpu.dynamic_rotate %0 by %c240_i32_15 dim 1 : vector<16x256xf32>, i32 -> vector<16x256xf32>
    %c240_i32_16 = arith.constant 240 : i32
    %44 = vector.broadcast %c240_i32_16 : i32 to vector<16x256xi32>
    %45 = arith.cmpi slt, %1, %44 : vector<16x256xi32>
    %cst_17 = arith.constant 0.000000e+00 : f32
    %46 = vector.broadcast %cst_17 : f32 to vector<16x256xf32>
    %47 = arith.select %45, %43, %46 : vector<16x256xi1>, vector<16x256xf32>
    %c239_i32 = arith.constant 239 : i32
    %48 = tpu.dynamic_rotate %0 by %c239_i32 dim 1 : vector<16x256xf32>, i32 -> vector<16x256xf32>
    %c240_i32_18 = arith.constant 240 : i32
    %49 = vector.broadcast %c240_i32_18 : i32 to vector<16x256xi32>
    %50 = arith.cmpi slt, %1, %49 : vector<16x256xi32>
    %c15_i32_19 = arith.constant 15 : i32
    %51 = vector.broadcast %c15_i32_19 : i32 to vector<16x256xi32>
    %52 = arith.cmpi slt, %3, %51 : vector<16x256xi32>
    %53 = arith.andi %50, %52 : vector<16x256xi1>
    %cst_20 = arith.constant 0.000000e+00 : f32
    %54 = vector.broadcast %cst_20 : f32 to vector<16x256xf32>
    %55 = arith.select %53, %48, %54 : vector<16x256xi1>, vector<16x256xf32>
    %56 = vector.extract_strided_slice %11 {offsets = [0, 0], sizes = [8, 256], strides = [1, 1]} : vector<16x256xf32> to vector<8x256xf32>
    %57 = vector.extract_strided_slice %16 {offsets = [0, 0], sizes = [8, 256], strides = [1, 1]} : vector<16x256xf32> to vector<8x256xf32>
    %58 = vector.extract_strided_slice %24 {offsets = [0, 0], sizes = [8, 256], strides = [1, 1]} : vector<16x256xf32> to vector<8x256xf32>
    %59 = vector.extract_strided_slice %29 {offsets = [0, 0], sizes = [8, 256], strides = [1, 1]} : vector<16x256xf32> to vector<8x256xf32>
    %60 = vector.extract_strided_slice %0 {offsets = [0, 0], sizes = [8, 256], strides = [1, 1]} : vector<16x256xf32> to vector<8x256xf32>
    %61 = vector.extract_strided_slice %34 {offsets = [0, 0], sizes = [8, 256], strides = [1, 1]} : vector<16x256xf32> to vector<8x256xf32>
    %62 = vector.extract_strided_slice %42 {offsets = [0, 0], sizes = [8, 256], strides = [1, 1]} : vector<16x256xf32> to vector<8x256xf32>
    %63 = vector.extract_strided_slice %47 {offsets = [0, 0], sizes = [8, 256], strides = [1, 1]} : vector<16x256xf32> to vector<8x256xf32>
    %64 = vector.extract_strided_slice %55 {offsets = [0, 0], sizes = [8, 256], strides = [1, 1]} : vector<16x256xf32> to vector<8x256xf32>
    %65 = tpu.concatenate %56, %57, %58, %59, %60, %61, %62, %63, %64 in 0 : vector<8x256xf32>, vector<8x256xf32>, vector<8x256xf32>, vector<8x256xf32>, vector<8x256xf32>, vector<8x256xf32>, vector<8x256xf32>, vector<8x256xf32>, vector<8x256xf32> -> vector<72x256xf32>
    %66 = vector.extract_strided_slice %11 {offsets = [8, 0], sizes = [8, 256], strides = [1, 1]} : vector<16x256xf32> to vector<8x256xf32>
    %67 = vector.extract_strided_slice %16 {offsets = [8, 0], sizes = [8, 256], strides = [1, 1]} : vector<16x256xf32> to vector<8x256xf32>
    %68 = vector.extract_strided_slice %24 {offsets = [8, 0], sizes = [8, 256], strides = [1, 1]} : vector<16x256xf32> to vector<8x256xf32>
    %69 = vector.extract_strided_slice %29 {offsets = [8, 0], sizes = [8, 256], strides = [1, 1]} : vector<16x256xf32> to vector<8x256xf32>
    %70 = vector.extract_strided_slice %0 {offsets = [8, 0], sizes = [8, 256], strides = [1, 1]} : vector<16x256xf32> to vector<8x256xf32>
    %71 = vector.extract_strided_slice %34 {offsets = [8, 0], sizes = [8, 256], strides = [1, 1]} : vector<16x256xf32> to vector<8x256xf32>
    %72 = vector.extract_strided_slice %42 {offsets = [8, 0], sizes = [8, 256], strides = [1, 1]} : vector<16x256xf32> to vector<8x256xf32>
    %73 = vector.extract_strided_slice %47 {offsets = [8, 0], sizes = [8, 256], strides = [1, 1]} : vector<16x256xf32> to vector<8x256xf32>
    %74 = vector.extract_strided_slice %55 {offsets = [8, 0], sizes = [8, 256], strides = [1, 1]} : vector<16x256xf32> to vector<8x256xf32>
    %75 = tpu.concatenate %66, %67, %68, %69, %70, %71, %72, %73, %74 in 0 : vector<8x256xf32>, vector<8x256xf32>, vector<8x256xf32>, vector<8x256xf32>, vector<8x256xf32>, vector<8x256xf32>, vector<8x256xf32>, vector<8x256xf32>, vector<8x256xf32> -> vector<72x256xf32>
    %76 = tpu.concatenate %65, %75 in 1 : vector<72x256xf32>, vector<72x256xf32> -> vector<72x512xf32>
    %c0_21 = arith.constant 0 : index
    %c0_22 = arith.constant 0 : index
    %77 = vector.load %arg2[%c0_21, %c0_22] : memref<8x72xf32, #tpu.memory_space<vmem>>, vector<8x72xf32>
    %cst_23 = arith.constant dense<0.000000e+00> : vector<8x512xf32>
    %78 = tpu.matmul %77, %76, %cst_23 {dimension_numbers = #tpu.dot_dimension_numbers<[1], [0], [0], [1], [0, 0, 1, 1], [], []>} : vector<8x72xf32>, vector<72x512xf32>, vector<8x512xf32> -> vector<8x512xf32>
    %cst_24 = arith.constant dense<0.000000e+00> : vector<8xf32>
    %79 = vector.multi_reduction <add>, %78, %cst_24 [1] : vector<8x512xf32> to vector<8xf32>
    %80 = vector.shape_cast %79 : vector<8xf32> to vector<8x1xf32>
    %cst_25 = arith.constant 5.120000e+02 : f32
    %81 = vector.broadcast %cst_25 : f32 to vector<8x1xf32>
    %82 = arith.divf %80, %81 : vector<8x1xf32>
    %83 = vector.broadcast %82 : vector<8x1xf32> to vector<8x512xf32>
    %84 = arith.subf %78, %83 : vector<8x512xf32>
    %85 = arith.mulf %84, %84 : vector<8x512xf32>
    %cst_26 = arith.constant dense<0.000000e+00> : vector<8xf32>
    %86 = vector.multi_reduction <add>, %85, %cst_26 [1] : vector<8x512xf32> to vector<8xf32>
    %87 = vector.shape_cast %86 : vector<8xf32> to vector<8x1xf32>
    %cst_27 = arith.constant 5.120000e+02 : f32
    %88 = vector.broadcast %cst_27 : f32 to vector<8x1xf32>
    %89 = arith.divf %87, %88 : vector<8x1xf32>
    %c0_28 = arith.constant 0 : index
    %c0_29 = arith.constant 0 : index
    %90 = vector.load %arg3[%c0_28, %c0_29] : memref<8x2xf32, #tpu.memory_space<vmem>>, vector<8x2xf32>
    %91 = vector.extract_strided_slice %90 {offsets = [0, 0], sizes = [8, 1], strides = [1, 1]} : vector<8x2xf32> to vector<8x1xf32>
    %92 = vector.extract_strided_slice %90 {offsets = [0, 1], sizes = [8, 1], strides = [1, 1]} : vector<8x2xf32> to vector<8x1xf32>
    %cst_30 = arith.constant 9.99999974E-6 : f32
    %93 = vector.broadcast %cst_30 : f32 to vector<8x1xf32>
    %94 = arith.addf %89, %93 : vector<8x1xf32>
    %95 = math.rsqrt %94 : vector<8x1xf32>
    %96 = arith.mulf %91, %95 : vector<8x1xf32>
    %97 = arith.mulf %82, %96 : vector<8x1xf32>
    %98 = arith.subf %92, %97 : vector<8x1xf32>
    %99 = vector.broadcast %96 : vector<8x1xf32> to vector<8x512xf32>
    %100 = arith.mulf %78, %99 : vector<8x512xf32>
    %101 = vector.broadcast %98 : vector<8x1xf32> to vector<8x512xf32>
    %102 = arith.addf %100, %101 : vector<8x512xf32>
    %103 = vector.extract_strided_slice %102 {offsets = [0, 0], sizes = [8, 256], strides = [1, 1]} : vector<8x512xf32> to vector<8x256xf32>
    %c0_31 = arith.constant 0 : index
    %c0_32 = arith.constant 0 : index
    %c0_33 = arith.constant 0 : index
    %104 = vector.load %arg4[%c0_31, %c0_32, %c0_33] : memref<2x8x256xf32, #tpu.memory_space<vmem>>, vector<1x8x256xf32>
    %105 = vector.shape_cast %104 : vector<1x8x256xf32> to vector<8x256xf32>
    %106 = vector.shape_cast %103 : vector<8x256xf32> to vector<1x8x256xf32>
    tpu.vector_store %arg4[%c0_31, %c0_32, %c0_33], %106 {strides = array<i32>} : memref<2x8x256xf32, #tpu.memory_space<vmem>>, vector<1x8x256xf32>,
    %107 = vector.extract_strided_slice %102 {offsets = [0, 256], sizes = [8, 256], strides = [1, 1]} : vector<8x512xf32> to vector<8x256xf32>
    %c1 = arith.constant 1 : index
    %c0_34 = arith.constant 0 : index
    %c0_35 = arith.constant 0 : index
    %108 = vector.load %arg4[%c1, %c0_34, %c0_35] : memref<2x8x256xf32, #tpu.memory_space<vmem>>, vector<1x8x256xf32>
    %109 = vector.shape_cast %108 : vector<1x8x256xf32> to vector<8x256xf32>
    %110 = vector.shape_cast %107 : vector<8x256xf32> to vector<1x8x256xf32>
    tpu.vector_store %arg4[%c1, %c0_34, %c0_35], %110 {strides = array<i32>} : memref<2x8x256xf32, #tpu.memory_space<vmem>>, vector<1x8x256xf32>,
    return
  }
  func.func @transform_0(%arg0: i32) -> (i32, i32) {
    %c0_i32 = arith.constant 0 : i32
    %c0_i32_0 = arith.constant 0 : i32
    %c0_i32_1 = arith.constant 0 : i32
    return %c0_i32, %c0_i32_0 : i32, i32
  }
  func.func @transform_1(%arg0: i32) -> (i32, i32) {
    %c0_i32 = arith.constant 0 : i32
    %c0_i32_0 = arith.constant 0 : i32
    %c0_i32_1 = arith.constant 0 : i32
    return %c0_i32, %c0_i32_0 : i32, i32
  }
  func.func @transform_2(%arg0: i32) -> (i32, i32) {
    %c0_i32 = arith.constant 0 : i32
    %c0_i32_0 = arith.constant 0 : i32
    %c0_i32_1 = arith.constant 0 : i32
    return %c0_i32, %c0_i32_0 : i32, i32
  }
  func.func @transform_3(%arg0: i32) -> (i32, i32, i32) {
    %c0_i32 = arith.constant 0 : i32
    %c0_i32_0 = arith.constant 0 : i32
    %c0_i32_1 = arith.constant 0 : i32
    %c0_i32_2 = arith.constant 0 : i32
    return %c0_i32, %c0_i32_0, %c0_i32_1 : i32, i32, i32
  }
}

</mosaic_0001>

<bundles_post_ra>
// kernel: tpu_custom_call.1
= control target key start
LH: loop header
LB: loop body
LE: loop exit
PB: predicated region body
PF: predicated region fallthrough
CT: control target
= control target key end

     0   :  { %8 = vsyncpa [#allocation3], 0  ;;  %s756_s0 = inlined_call_operand.hbm [shape: f32[16,256], index: 0, kind: input, shape index: {}]   ;;  %s757_s1 = inlined_call_operand.vmem [shape: f32[8,72], index: 1, kind: input, shape index: {}]   ;;  %s758_s2 = inlined_call_operand.vmem [shape: f32[8,2], index: 2, kind: input, shape index: {}]   ;;  %s759_s3 = inlined_call_operand.hbm [shape: f32[2,8,256], index: 3, kind: output, shape index: {}]  }
   0x1   :  { %9 = vsyncpa [#allocation4], 0  ;;  %s14_s14 = sshll.u32 %s756_s0, 4  ;;  %s470_s15 = smov [#allocation2]   ;;  %s15_s14 = int_to_ptr.hbm [resolvable:$true] %s14_s14 }
   0x2   :  { %s16_s16 = sshll.u32 %s470_s15, 4  ;;  %s471_s17 = smov 256   ;;  %s17_s16 = int_to_ptr.vmem [resolvable:$true] %s16_s16 }
   0x3   :  { %s472_s18 = smov 16  }
   0x4   :  { %22 = dma.hbm_to_vmem [thread:$0]  %s15_s14, 512, %s17_s16, [#allocation3], %s471_s17, %s471_s17, %s472_s18  }
   0x5   :  { %466 = dma.done.wait [#allocation3], 512  }
   0x6   :  { %467 = vsyncadd [#allocation3], 4294966784  ;;  %v510_v0 = vld [vmem:[#allocation2 + $0x10] sm:$0xff]  ;;  %s473_s19 = smov 112   ;;  %s474_s20 = smov 111   ;;  %v515_v1 = vld [vmem:[#allocation2 + $0x18] sm:$0xff]  ;;  %v35_v5 = vlaneseq }
   0x7   :  { %158 = vrot.lane.b32.xlu1 %v510_v0, %s473_s19  ;;  %175 = vrot.lane.b32.xlu0 %v510_v0, %s474_s20  ;;  %s475_s0 = smov 113   ;;  %v520_v2 = vld [vmem:[#allocation2 + $0x8] sm:$0xff]  ;;  %v522_v3 = vld [vmem:[#allocation2] sm:$0xff]  ;;  %s476_s21 = smov 127  }
   0x8   :  { %137 = vrot.lane.b32.xlu2 %v510_v0, %s475_s0  ;;  %s477_s22 = smov 1   ;;  %s478_s23 = smov 15   ;;  %v558_v6 = vand.u32 127, %v35_v5 }
   0x9   :  { %s479_s24 = smov 17   ;;  %s352_s4 = sshll.u32 %s759_s3, 4  ;;  %s353_s4 = int_to_ptr.hbm [resolvable:$true] %s352_s4 }
   0xa   :  { %v37_v8 = vadd.s32 128, %v558_v6  ;;  %v38_v13 = vand.u32 15, %v558_v6  ;;  %vm181_vm2 = vcmp.lt.s32.totalorder %v558_v6, 111  ;;  %vm164_vm5 = vcmp.lt.s32.totalorder %v558_v6, 112 }
   0xb   :  { %vm143_vm7 = vcmp.lt.s32.totalorder %v558_v6, 113  ;;  %vm126_vm10 = vcmp.lt.s32.totalorder %v558_v6, 127  ;;  %vm109_vm11 = vcmp.lt.s32.totalorder %v558_v6, 1  ;;  %vm53_vm12 = vcmp.ge.s32.totalorder %v558_v6, 16 }
   0xc   :  { %v39_v11 = vand.u32 15, %v37_v8  ;;  %vm149_vm1 = vcmp.lt.s32.totalorder %v37_v8, 240  ;;  %vm567_vm3 = vcmp.lt.s32.totalorder %v38_v13, 15  ;;  %vm596_vm8 = vcmp.ge.s32.totalorder %v38_v13, 1 }
   0xd   :  { %vm88_vm13 = vcmp.lt.s32.totalorder %v558_v6, 15  ;;  %vm673_vm14 = vmand %vm53_vm12, %vm567_vm3  ;;  %vm71_vm15 = vcmp.lt.s32.totalorder %v558_v6, 16 }
   0xe   :  { %vm562_vm0 = vcmp.lt.s32.totalorder %v39_v11, 15  ;;  %vm579_vm6 = vcmp.ge.s32.totalorder %v39_v11, 1 }
   0xf   :  { %162 = vrot.lane.b32.xlu1 %v515_v1, %s473_s19  ;;  %179 = vrot.lane.b32.xlu0 %v515_v1, %s474_s20  ;;  %vm574_vm4 = vmand %vm149_vm1, %vm562_vm0 }
  0x10   :  { %141 = vrot.lane.b32.xlu2 %v515_v1, %s475_s0  ;;  %vm603_vm9 = vmand %vm149_vm1, %vm579_vm6 }
  0x17   :  { %177 = vrot.lane.b32.xlu1 %v520_v2, %s474_s20  ;;  %173 = vrot.lane.b32.xlu0 %v522_v3, %s474_s20 }
  0x18   :  { %120 = vrot.lane.b32.xlu2 %v510_v0, %s476_s21 }
  0x1f   :  { %156 = vrot.lane.b32.xlu1 %v522_v3, %s473_s19  ;;  %124 = vrot.lane.b32.xlu0 %v515_v1, %s476_s21 }
  0x20   :  { %160 = vrot.lane.b32.xlu2 %v520_v2, %s473_s19 }
  0x27   :  { %139 = vrot.lane.b32.xlu1 %v520_v2, %s475_s0  ;;  %135 = vrot.lane.b32.xlu0 %v522_v3, %s475_s0 }
  0x28   :  { %103 = vrot.lane.b32.xlu2 %v510_v0, %s477_s22 }
  0x2f   :  { %118 = vrot.lane.b32.xlu1 %v522_v3, %s476_s21  ;;  %107 = vrot.lane.b32.xlu0 %v515_v1, %s477_s22 }
  0x30   :  { %122 = vrot.lane.b32.xlu2 %v520_v2, %s476_s21 }
  0x37   :  { %86 = vrot.lane.b32.xlu1 %v515_v1, %s478_s23  ;;  %82 = vrot.lane.b32.xlu0 %v510_v0, %s478_s23 }
  0x38   :  { %65 = vrot.lane.b32.xlu2 %v510_v0, %s472_s18 }
  0x3f   :  { %101 = vrot.lane.b32.xlu1 %v522_v3, %s477_s22  ;;  %69 = vrot.lane.b32.xlu0 %v515_v1, %s472_s18 }
  0x40   :  { %105 = vrot.lane.b32.xlu2 %v520_v2, %s477_s22 }
  0x47   :  { %46 = vrot.lane.b32.xlu1 %v515_v1, %s479_s24  ;;  %42 = vrot.lane.b32.xlu0 %v510_v0, %s479_s24 }
  0x48   :  { %80 = vrot.lane.b32.xlu2 %v522_v3, %s478_s23 }
  0x4f   :  { %63 = vrot.lane.b32.xlu1 %v522_v3, %s472_s18  ;;  %84 = vrot.lane.b32.xlu0 %v520_v2, %s478_s23 }
  0x50   :  { %67 = vrot.lane.b32.xlu2 %v520_v2, %s472_s18 }
  0x57   :  { %44 = vrot.lane.b32.xlu1 %v520_v2, %s479_s24  ;;  %40 = vrot.lane.b32.xlu0 %v522_v3, %s479_s24 }
  0x62   :  { %v138_v4 = vpop.permute.xlu2 %137 }
  0x6a   :  { %v142_v7 = vpop.permute.xlu2 %141 }
  0x6b   :  { %v145_v27 = vsel %vm143_vm7, %v138_v4, %v142_v7  ;;  %v147_v28 = vsel %vm143_vm7, %v142_v7, %v138_v4  ;;  %v192_v4 = vld [vmem:[%s757_s1] sm:$0xff] }
  0x72   :  { %v121_v12 = vpop.permute.xlu2 %120 }
  0x79   :  { %v159_v9 = vpop.permute.xlu1 %158  ;;  %v176_v10 = vpop.permute.xlu0 %175 }
  0x7a   :  { %v161_v26 = vpop.permute.xlu2 %160 }
  0x81   :  { %v163_v17 = vpop.permute.xlu1 %162  ;;  %v180_v18 = vpop.permute.xlu0 %179 }
  0x82   :  { %v183_v20 = vsel %vm181_vm2, %v176_v10, %v180_v18  ;;  %v185_v21 = vsel %vm181_vm2, %v180_v18, %v176_v10  ;;  %v166_v22 = vsel %vm164_vm5, %v159_v9, %v163_v17  ;;  %v168_v23 = vsel %vm164_vm5, %v163_v17, %v159_v9  ;;  %v104_v33 = vpop.permute.xlu2 %103 }
  0x83   :  { %381 = vmatpush.msk.msra.mxu2 %vm567_vm3, %v183_v20  ;;  %389 = vmatpush.msk.msra.mxu3 %vm574_vm4, %v185_v21 }
  0x85   :  { %245 = vmatpush.msra.mxu2 %v166_v22  ;;  %390 = vmatpush.msk.msra.mxu3 %vm149_vm1, %v168_v23 }
  0x87   :  { %382 = vmatpush.msk.msra.mxu2 %vm596_vm8, %v145_v27  ;;  %391 = vmatpush.msk.msra.mxu3 %vm603_vm9, %v147_v28 }
  0x89   :  { %v178_v29 = vpop.permute.xlu1 %177  ;;  %v174_v30 = vpop.permute.xlu0 %173 }
  0x8a   :  { %v182_v31 = vsel %vm181_vm2, %v174_v30, %v178_v29  ;;  %v184_v32 = vsel %vm181_vm2, %v178_v29, %v174_v30  ;;  %v123_v40 = vpop.permute.xlu2 %122  ;;  %vm705_vm2 = vmand %vm53_vm12, %vm596_vm8 }
  0x8b   :  { %365 = vmatpush.msk.msra.mxu0 %vm567_vm3, %v182_v31  ;;  %373 = vmatpush.msk.msra.mxu1 %vm574_vm4, %v184_v32 }
  0x91   :  { %v157_v34 = vpop.permute.xlu1 %156  ;;  %v125_v35 = vpop.permute.xlu0 %124 }
  0x92   :  { %v165_v36 = vsel %vm164_vm5, %v157_v34, %v161_v26  ;;  %v167_v37 = vsel %vm164_vm5, %v161_v26, %v157_v34  ;;  %v128_v38 = vsel %vm126_vm10, %v121_v12, %v125_v35  ;;  %v130_v39 = vsel %vm126_vm10, %v125_v35, %v121_v12  ;;  %v66_v51 = vpop.permute.xlu2 %65 }
  0x93   :  { %205 = vmatpush.msra.mxu0 %v165_v36  ;;  %374 = vmatpush.msk.msra.mxu1 %vm149_vm1, %v167_v37  ;;  %vm48_vm1 = vcmp.lt.s32.totalorder %v558_v6, 17  ;;  %v480_v6 = vmov 512.0  }
  0x94   :  { %383 = vmatpush.msk.msra.mxu2 %vm567_vm3, %v128_v38  ;;  %392 = vmatpush.msk.msra.mxu3 %vm562_vm0, %v130_v39  ;;  %414 = vrcp.f32 %v480_v6 }
  0x96   :  { %248 = vmatpush.msra.mxu2 %v510_v0  ;;  %268 = vmatpush.msra.mxu3 %v515_v1 }
  0x99   :  { %v140_v41 = vpop.permute.xlu1 %139  ;;  %v136_v42 = vpop.permute.xlu0 %135 }
  0x9a   :  { %v144_v43 = vsel %vm143_vm7, %v136_v42, %v140_v41  ;;  %v146_v44 = vsel %vm143_vm7, %v140_v41, %v136_v42  ;;  %v106_v57 = vpop.permute.xlu2 %105  ;;  %v415_v27 = vpop.eup %414 }
  0x9b   :  { %366 = vmatpush.msk.msra.mxu0 %vm596_vm8, %v144_v43  ;;  %375 = vmatpush.msk.msra.mxu1 %vm603_vm9, %v146_v44  ;;  %v283_v28 = vmul.f32 512.0, %v415_v27 }
  0x9d   :  { %v284_v29 = vsub.f32 1.0, %v283_v28 }
  0x9f   :  { %v285_v30 = vmul.f32 %v415_v27, %v284_v29 }
  0xa1   :  { %v119_v45 = vpop.permute.xlu1 %118  ;;  %v108_v46 = vpop.permute.xlu0 %107  ;;  %v286_v19 = vadd.f32 %v415_v27, %v285_v30 }
  0xa2   :  { %v127_v47 = vsel %vm126_vm10, %v119_v45, %v123_v40  ;;  %v129_v48 = vsel %vm126_vm10, %v123_v40, %v119_v45  ;;  %v113_v49 = vsel %vm109_vm11, %v108_v46, %v104_v33  ;;  %v111_v50 = vsel %vm109_vm11, %v104_v33, %v108_v46  ;;  %v81_v0 = vpop.permute.xlu2 %80 }
  0xa3   :  { %367 = vmatpush.msk.msra.mxu0 %vm567_vm3, %v127_v47  ;;  %376 = vmatpush.msk.msra.mxu1 %vm562_vm0, %v129_v48  ;;  %vm193_vm3 = vcmask 588800   ;;  %v481_v45 = vmov 0  }
  0xa4   :  { %384 = vmatpush.msk.msra.mxu2 %vm596_vm8, %v113_v49  ;;  %393 = vmatpush.msk.msra.mxu3 %vm579_vm6, %v111_v50 }
  0xa5   :  { %208 = vmatpush.msra.mxu0 %v522_v3  ;;  %228 = vmatpush.msra.mxu1 %v520_v2 }
  0xa6   :  { %411 = vset.pattern.permute.xlu1 %v481_v45 }
  0xa9   :  { %v87_v53 = vpop.permute.xlu1 %86  ;;  %v83_v54 = vpop.permute.xlu0 %82 }
  0xaa   :  { %v92_v55 = vsel %vm88_vm13, %v87_v53, %v83_v54  ;;  %v90_v56 = vsel %vm88_vm13, %v83_v54, %v87_v53  ;;  %v68_v8 = vpop.permute.xlu2 %67 }
  0xab   :  { %385 = vmatpush.msk.msra.mxu2 %vm673_vm14, %v92_v55  ;;  %394 = vmatpush.msk.msra.mxu3 %vm562_vm0, %v90_v56  ;;  %v304_v55 = vld [vmem:[%s758_s2] sm:$0xff]  ;;  %s483_s2 = smov [#allocation5]  }
  0xac   :  { %s350_s28 = sshll.u32 %s483_s2, 4  ;;  %s351_s28 = int_to_ptr.vmem [resolvable:$true] %s350_s28 }
  0xb1   :  { %v102_v58 = vpop.permute.xlu1 %101  ;;  %v70_v59 = vpop.permute.xlu0 %69 }
  0xb2   :  { %v112_v60 = vsel %vm109_vm11, %v106_v57, %v102_v58  ;;  %v110_v61 = vsel %vm109_vm11, %v102_v58, %v106_v57  ;;  %v75_v62 = vsel %vm71_vm15, %v70_v59, %v66_v51  ;;  %v73_v63 = vsel %vm71_vm15, %v66_v51, %v70_v59 }
  0xb3   :  { %368 = vmatpush.msk.msra.mxu0 %vm596_vm8, %v112_v60  ;;  %377 = vmatpush.msk.msra.mxu1 %vm579_vm6, %v110_v61  ;;  %v482_v59 = vmov 1  }
  0xb4   :  { %386 = vmatpush.msk.msra.mxu2 %vm53_vm12, %v75_v62  ;;  %271 = vmatpush.msra.mxu3 %v73_v63 }
  0xb5   :  { %413 = vset.pattern.permute.xlu0 %v482_v59 }
  0xb9   :  { %v47_v2 = vpop.permute.xlu1 %46  ;;  %v43_v3 = vpop.permute.xlu0 %42 }
  0xba   :  { %v52_v5 = vsel %vm48_vm1, %v47_v2, %v43_v3  ;;  %v50_v7 = vsel %vm48_vm1, %v43_v3, %v47_v2 }
  0xbb   :  { %387 = vmatpush.msk.msra.mxu2 %vm705_vm2, %v52_v5  ;;  %395 = vmatpush.msk.msra.mxu3 %vm579_vm6, %v50_v7 }
  0xbc   :  { %388 = vmatmul.msk.f32.vlgmr.msra.gmra.mxu2 %vm193_vm3, %v192_v4  ;;  %396 = vmatmul.msk.f32.vlgmr.msra.gmra.mxu3 %vm193_vm3, %v192_v4 }
  0xc1   :  { %v64_v9 = vpop.permute.xlu1 %63  ;;  %v85_v10 = vpop.permute.xlu0 %84 }
  0xc2   :  { %v91_v11 = vsel %vm88_vm13, %v85_v10, %v81_v0  ;;  %v89_v12 = vsel %vm88_vm13, %v81_v0, %v85_v10  ;;  %v74_v13 = vsel %vm71_vm15, %v68_v8, %v64_v9  ;;  %v72_v15 = vsel %vm71_vm15, %v64_v9, %v68_v8 }
  0xc3   :  { %369 = vmatpush.msk.msra.mxu0 %vm673_vm14, %v91_v11  ;;  %378 = vmatpush.msk.msra.mxu1 %vm562_vm0, %v89_v12  ;;  %vm287_vm0 = vweird.f32 %v415_v27 }
  0xc4   :  { %v288_v31 = vsel %vm287_vm0, %v415_v27, %v286_v19 }
  0xc5   :  { %370 = vmatpush.msk.msra.mxu0 %vm53_vm12, %v74_v13  ;;  %231 = vmatpush.msra.mxu1 %v72_v15 }
  0xc9   :  { %v45_v16 = vpop.permute.xlu1 %44  ;;  %v41_v17 = vpop.permute.xlu0 %40 }
  0xca   :  { %v51_v18 = vsel %vm48_vm1, %v45_v16, %v41_v17  ;;  %v49_v20 = vsel %vm48_vm1, %v41_v17, %v45_v16 }
  0xcb   :  { %371 = vmatpush.msk.msra.mxu0 %vm705_vm2, %v51_v18  ;;  %379 = vmatpush.msk.msra.mxu1 %vm579_vm6, %v49_v20 }
  0xcc   :  { %372 = vmatmul.msk.f32.vlgmr.msra.gmra.mxu0 %vm193_vm3, %v192_v4  ;;  %380 = vmatmul.msk.f32.vlgmr.msra.gmra.mxu1 %vm193_vm3, %v192_v4 }
 0x13f   :  { %v254_v14 = vpop.f32.mrf.mxu2  ;;  %v274_v24 = vpop.f32.mrf.mxu3 }
 0x149   :  { %v214_v21 = vpop.f32.mrf.mxu0  ;;  %v234_v22 = vpop.f32.mrf.mxu1 }
 0x14a   :  { %v277_v23 = vadd.f32 %v234_v22, %v214_v21 }
 0x14c   :  { %v278_v25 = vadd.f32 %v277_v23, %v254_v14 }
 0x14e   :  { %v279_v26 = vadd.f32 %v278_v25, %v274_v24 }
 0x150   :  { %280 = vadd.xlane.f32.xlu2 %v279_v26 }
 0x1c3   :  { %v281_v32 = vpop.xlane.xlu2 %280 }
 0x1c4   :  { %v289_v33 = vmul.f32 %v288_v31, %v281_v32 }
 0x1c6   :  { %v290_v34 = vsub.f32 %v214_v21, %v289_v33  ;;  %v291_v35 = vsub.f32 %v234_v22, %v289_v33  ;;  %v292_v36 = vsub.f32 %v254_v14, %v289_v33  ;;  %v293_v37 = vsub.f32 %v274_v24, %v289_v33 }
 0x1c8   :  { %v294_v38 = vmul.f32 %v290_v34, %v290_v34  ;;  %v295_v39 = vmul.f32 %v291_v35, %v291_v35  ;;  %v296_v40 = vmul.f32 %v292_v36, %v292_v36  ;;  %v297_v42 = vmul.f32 %v293_v37, %v293_v37 }
 0x1ca   :  { %v298_v41 = vadd.f32 %v295_v39, %v294_v38 }
 0x1cc   :  { %v299_v43 = vadd.f32 %v298_v41, %v296_v40 }
 0x1ce   :  { %v300_v44 = vadd.f32 %v299_v43, %v297_v42 }
 0x1d0   :  { %301 = vadd.xlane.f32.xlu0 %v300_v44 }
 0x243   :  { %v302_v46 = vpop.xlane.xlu0 %301 }
 0x244   :  { %v303_v47 = vmul.f32 %v302_v46, %v288_v31 }
 0x246   :  { %v305_v48 = vadd.f32 1e-05, %v303_v47 }
 0x248   :  { %416 = vrsqrt.f32 %v305_v48  ;;  %vm312_vm5 = vweird.f32 %v305_v48 }
 0x24e   :  { %v417_v49 = vpop.eup %416 }
 0x24f   :  { %v307_v50 = vmul.f32 %v417_v49, %v305_v48  ;;  %vm313_vm4 = vweird.f32 %v417_v49 }
 0x250   :  { %vm314_vm6 = vmor %vm312_vm5, %vm313_vm4 }
 0x251   :  { %v308_v51 = vmul.f32 %v417_v49, %v307_v50 }
 0x253   :  { %v309_v52 = vmul.f32 0.5, %v308_v51 }
 0x255   :  { %v310_v53 = vsub.f32 1.5, %v309_v52 }
 0x257   :  { %v311_v54 = vmul.f32 %v417_v49, %v310_v53 }
 0x259   :  { %v315_v56 = vsel %vm314_vm6, %v417_v49, %v311_v54 }
 0x25a   :  { %v316_v57 = vmul.f32 %v315_v56, %v304_v55 }
 0x25c   :  { %v317_v58 = vmul.f32 %v316_v57, %v289_v33 }
 0x25e   :  { %319 = vrot.lane.b32.xlu1 %v317_v58, %s477_s22 }
 0x266   :  { %325 = vperm.xlu1 %411, %v316_v57  }
 0x26e   :  { %412 = vset.pattern.permute.xlu1 %v482_v59 }
 0x2d0   :  { %v320_v60 = vpop.permute.xlu1 %319 }
 0x2d1   :  { %v322_v61 = vsub.f32 %v304_v55, %v320_v60 }
 0x2d3   :  { %334 = vperm.xlu1 %412, %v322_v61  }
 0x2d8   :  { %v326_v62 = vpop.permute.xlu1 %325 }
 0x2d9   :  { %v328_v63 = vmul.f32 %v326_v62, %v214_v21  ;;  %v329_v0 = vmul.f32 %v326_v62, %v234_v22  ;;  %v330_v1 = vmul.f32 %v326_v62, %v254_v14  ;;  %v331_v2 = vmul.f32 %v326_v62, %v274_v24 }
 0x345   :  { %v335_v3 = vpop.permute.xlu1 %334 }
 0x346   :  { %v337_v4 = vadd.f32 %v335_v3, %v328_v63  ;;  %v338_v5 = vadd.f32 %v335_v3, %v329_v0  ;;  %v339_v7 = vadd.f32 %v335_v3, %v330_v1  ;;  %v340_v8 = vadd.f32 %v335_v3, %v331_v2 }
 0x348   :  { %341 = vst [vmem:[#allocation5] sm:$0xff] %v337_v4 }
 0x349   :  { %342 = vst [vmem:[#allocation5 + $0x8] sm:$0xff] %v338_v5 }
 0x34a   :  { %344 = vst [vmem:[#allocation5 + $0x10] sm:$0xff] %v339_v7 }
 0x34b   :  { %345 = vst [vmem:[#allocation5 + $0x18] sm:$0xff] %v340_v8 }
 0x34c   :  { %358 = dma.vmem_to_hbm [thread:$0]  %s351_s28, 512, %s353_s4, [#allocation4], %s471_s17, %s471_s17, %s472_s18  }
 0x34d   :  { %468 = dma.done.wait [#allocation4], 512  }
 0x34e   :  { %469 = vsyncadd [#allocation4], 4294966784 }
 0x34f   :  { %363 = vsyncpa [#allocation3], 1 }
 0x350   :  { %364 = vsyncpa [#allocation4], 1 }

</bundles_post_ra>
